<compile_context>
chip_gen: v7x
topology: tpu7x:2x2x1
jax: 0.10.0
libtpu: 0.0.40
codegen_flags: <defaults>
</compile_context>

<pallas_src>
import jax
import jax.numpy as jnp
from jax.experimental import pallas as pl
from jax.experimental.pallas import tpu as pltpu

LANE = 128   # lane width (last-dim tiling)
SUB = 16     # bf16 sublane packing for the x tile / batch axis


def _round_up(x, m):
    return (x + m - 1) // m * m


def _vmem_budget_bytes():
    """~75% of the per-TC VMEM capacity, with headroom for Mosaic scratch."""
    try:
        cap = int(pltpu.get_tpu_info().vmem_capacity_bytes)
    except Exception:
        cap = 64 * 2**20  # conservative fallback: v7x has the smallest VMEM/TC
    return int(min(0.75 * cap, cap - 8 * 2**20))


# --------------------------------------------------------------------------- #
# Kernel
# --------------------------------------------------------------------------- #
def mlp_kernel(x_ref,
               w1_ref, b1_ref, w2_ref, b2_ref, w3_ref, b3_ref,
               w4_ref, b4_ref, w5_ref, b5_ref, w6_ref, b6_ref,
               o_ref):
    """Entire 6-layer MLP forward for one batch tile, fused in VMEM."""
    h = x_ref[...]  # bf16 [block_m, in_p]

    def hidden_layer(h_bf16, w_ref, b_ref):
        y = jnp.dot(h_bf16, w_ref[...], preferred_element_type=jnp.float32)
        y = jnp.maximum(y + b_ref[...], 0.0)       # f32 epilogue on the VPU
        return y.astype(jnp.bfloat16)              # bf16 operand for next MXU pass

    h = hidden_layer(h, w1_ref, b1_ref)
    h = hidden_layer(h, w2_ref, b2_ref)
    h = hidden_layer(h, w3_ref, b3_ref)
    h = hidden_layer(h, w4_ref, b4_ref)
    h = hidden_layer(h, w5_ref, b5_ref)
    # Final layer: no ReLU, f32 output store (lane-dense: out dim padded to 128).
    o_ref[...] = (jnp.dot(h, w6_ref[...], preferred_element_type=jnp.float32)
                  + b6_ref[...]).astype(o_ref.dtype)


# --------------------------------------------------------------------------- #
# Parameter preparation (done ONCE, outside the hot path)
# --------------------------------------------------------------------------- #
def prepare_params(params):
    """Pad every feature dim to a multiple of 128 and cast weights to bf16.

    params: list of 6 (W [in, out] f32, b [1, out] f32) tuples
            (W is the transpose of PyTorch's [out, in] layout).
    Returns (flat_padded_arrays, dims, dims_p).
    """
    dims = [params[0][0].shape[0]] + [w.shape[1] for w, _ in params]
    dims_p = [_round_up(d, LANE) for d in dims]
    flat = []
    for li, (w, b) in enumerate(params):
        di, do = w.shape
        di_p, do_p = dims_p[li], dims_p[li + 1]
        w_p = jnp.pad(w.astype(jnp.bfloat16), ((0, di_p - di), (0, do_p - do)))
        b_p = jnp.pad(b.reshape(1, do).astype(jnp.float32), ((0, 0), (0, do_p - do)))
        flat.extend([w_p, b_p])
    return tuple(flat), tuple(dims), tuple(dims_p)


# --------------------------------------------------------------------------- #
# Forward wrapper
# --------------------------------------------------------------------------- #
def simple_mlp_forward(x, prepared, *, block_m=None):
    """Fused SimpleMLP forward.

    x:        [B, in_size] float32
    prepared: output of prepare_params(params)
    Returns   [B, out_size] float32.
    """
    flat, dims, dims_p = prepared
    B, in_size = x.shape
    assert in_size == dims[0], "input feature dim mismatch"
    out_size, in_p, out_p = dims[-1], dims_p[0], dims_p[-1]

    # ---- generation-aware VMEM budgeting ------------------------------------
    budget = _vmem_budget_bytes()
    # Weights/biases are single-buffered (Buffered(1)) -> 1x footprint.
    weights_b = sum(int(a.size) * a.dtype.itemsize for a in flat)
    # Per-batch-row streamed VMEM: double-buffered x (bf16) and o (f32) tiles
    # plus the widest f32 activation and its bf16 copy.
    per_row = 2 * in_p * 2 + 2 * out_p * 4 + max(dims_p) * (4 + 2)
    avail = budget - weights_b - (2 << 20)  # slack for Mosaic internal scratch
    if avail < SUB * per_row:
        # TODO(synk): stream weights layer-by-layer (second grid axis /
        # pltpu.emit_pipeline with a 2-deep weight buffer) instead of failing,
        # to keep activations fused for very large hidden sizes.
        raise ValueError(
            f"resident-weight fusion does not fit the VMEM budget "
            f"({weights_b / 2**20:.1f} MiB of weights vs {budget / 2**20:.1f} MiB)")

    # ---- batch tiling --------------------------------------------------------
    bm_full = _round_up(B, SUB)
    if block_m is None:
        cap_m = max(SUB, min(1024, (avail // per_row) // SUB * SUB))
        block_m = min(cap_m, bm_full)
        # Prefer >=2 grid steps (pipelines x/o DMA, shards batch over v7x's 2
        # TCs) only when each half still has >=128 rows; tiny batches run as a
        # single step to avoid per-step overhead and MXU fill/drain waste.
        if bm_full // block_m < 2 and bm_full >= 256:
            block_m = min(block_m, _round_up(bm_full // 2, SUB))
    block_m = _round_up(int(block_m), SUB)

    B_p = _round_up(B, block_m)
    grid = (B_p // block_m,)

    # ---- pad + cast the input (single fused pass) ---------------------------
    x_p = jnp.pad(x.astype(jnp.bfloat16), ((0, B_p - B), (0, in_p - in_size)))

    # ---- BlockSpecs ----------------------------------------------------------
    def resident(arr):
        # Whole array resident in VMEM, single-buffered (constant index_map).
        try:
            return pl.BlockSpec(arr.shape, lambda i: (0, 0),
                                pipeline_mode=pl.Buffered(1))
        except TypeError:  # older jax without pipeline_mode: fall back to default
            return pl.BlockSpec(arr.shape, lambda i: (0, 0))

    in_specs = [pl.BlockSpec((block_m, in_p), lambda i: (i, 0))]
    in_specs += [resident(a) for a in flat]
    out_specs = pl.BlockSpec((block_m, out_p), lambda i: (i, 0))

    # ---- advisory cost estimate ---------------------------------------------
    flops = 2 * B_p * sum(dims_p[i] * dims_p[i + 1] for i in range(len(dims_p) - 1))
    bytes_accessed = x_p.size * 2 + weights_b + B_p * out_p * 4
    cost = pl.CostEstimate(flops=flops, transcendentals=0,
                           bytes_accessed=int(bytes_accessed))

    out = pl.pallas_call(
        mlp_kernel,
        out_shape=jax.ShapeDtypeStruct((B_p, out_p), jnp.float32),
        grid_spec=pl.GridSpec(grid=grid, in_specs=in_specs, out_specs=out_specs),
        compiler_params=pltpu.CompilerParams(
            dimension_semantics=("parallel",),
            vmem_limit_bytes=int(budget)),
        cost_estimate=cost,
    )(x_p, *flat)

    return out[:B, :out_size]


# --------------------------------------------------------------------------- #
# Init + pure-JAX reference
# --------------------------------------------------------------------------- #
def init_params(key, in_size, hidden_size, out_size):
    """Deterministic init mimicking nn.Linear's U(-1/sqrt(fan_in), 1/sqrt(fan_in))."""
    dims = [in_size] + [hidden_size] * 5 + [out_size]
    params = []
    for i in range(6):
        fan_in, fan_out = dims[i], dims[i + 1]
        key, kw, kb = jax.random.split(key, 3)
        bound = 1.0 / (fan_in ** 0.5)
        w = jax.random.uniform(kw, (fan_in, fan_out), jnp.float32, -bound, bound)
        b = jax.random.uniform(kb, (1, fan_out), jnp.float32, -bound, bound)
        params.append((w, b))
    return params


def reference_forward(x, params, *, emulate_bf16=True):
    """Pure-JAX reference; emulate_bf16=True matches the kernel's mixed precision."""
    cast = (lambda a: a.astype(jnp.bfloat16)) if emulate_bf16 else (lambda a: a)
    h = cast(x)
    n = len(params)
    for i, (w, b) in enumerate(params):
        y = jnp.dot(h, cast(w), preferred_element_type=jnp.float32) + b.reshape(1, -1)
        h = cast(jnp.maximum(y, 0.0)) if i < n - 1 else y
    return h


if __name__ == "__main__":
    in_size, hidden_size, out_size = 16, 32, 8
    batch = 32

    key = jax.random.PRNGKey(0)
    key, kx = jax.random.split(key)
    x = jax.random.normal(kx, (batch, in_size), jnp.float32)
    params = init_params(key, in_size, hidden_size, out_size)

    prepared = prepare_params(params)          # one-time padding/cast (hoisted)
    out = jax.block_until_ready(simple_mlp_forward(x, prepared))

    ref_mixed = reference_forward(x, params, emulate_bf16=True)
    ref_f32 = reference_forward(x, params, emulate_bf16=False)
    assert out.shape == (batch, out_size)
    assert jnp.allclose(out, ref_mixed, atol=2e-2, rtol=2e-2), "mismatch vs bf16 reference"
    assert jnp.allclose(out, ref_f32, atol=5e-2, rtol=5e-2), "mismatch vs f32 reference"

    print("KERNEL_OK")
</pallas_src>

<mosaic_0001>
module attributes {stable_mosaic.version = 11 : i64} {
  func.func @mlp_kernel(%arg0: i32, %arg1: memref<32x128xbf16, #tpu.memory_space<vmem>>, %arg2: memref<128x128xbf16, #tpu.memory_space<vmem>>, %arg3: memref<1x128xf32, #tpu.memory_space<vmem>>, %arg4: memref<128x128xbf16, #tpu.memory_space<vmem>>, %arg5: memref<1x128xf32, #tpu.memory_space<vmem>>, %arg6: memref<128x128xbf16, #tpu.memory_space<vmem>>, %arg7: memref<1x128xf32, #tpu.memory_space<vmem>>, %arg8: memref<128x128xbf16, #tpu.memory_space<vmem>>, %arg9: memref<1x128xf32, #tpu.memory_space<vmem>>, %arg10: memref<128x128xbf16, #tpu.memory_space<vmem>>, %arg11: memref<1x128xf32, #tpu.memory_space<vmem>>, %arg12: memref<128x128xbf16, #tpu.memory_space<vmem>>, %arg13: memref<1x128xf32, #tpu.memory_space<vmem>>, %arg14: memref<32x128xf32, #tpu.memory_space<vmem>>) attributes {dimension_semantics = [#tpu.dimension_semantics<parallel>], iteration_bounds = array<i64: 1>, scalar_prefetch = 0 : i64, scratch_operands = 0 : i64, tpu.core_type = #tpu.core_type<tc>, window_params = [{transform_indices = @transform_0, window_bounds = array<i64: 32, 128>}, {pipeline_mode = #tpu.pipeline_mode<synchronous>, transform_indices = @transform_1, window_bounds = array<i64: 128, 128>}, {pipeline_mode = #tpu.pipeline_mode<synchronous>, transform_indices = @transform_2, window_bounds = array<i64: 1, 128>}, {pipeline_mode = #tpu.pipeline_mode<synchronous>, transform_indices = @transform_3, window_bounds = array<i64: 128, 128>}, {pipeline_mode = #tpu.pipeline_mode<synchronous>, transform_indices = @transform_4, window_bounds = array<i64: 1, 128>}, {pipeline_mode = #tpu.pipeline_mode<synchronous>, transform_indices = @transform_5, window_bounds = array<i64: 128, 128>}, {pipeline_mode = #tpu.pipeline_mode<synchronous>, transform_indices = @transform_6, window_bounds = array<i64: 1, 128>}, {pipeline_mode = #tpu.pipeline_mode<synchronous>, transform_indices = @transform_7, window_bounds = array<i64: 128, 128>}, {pipeline_mode = #tpu.pipeline_mode<synchronous>, transform_indices = @transform_8, window_bounds = array<i64: 1, 128>}, {pipeline_mode = #tpu.pipeline_mode<synchronous>, transform_indices = @transform_9, window_bounds = array<i64: 128, 128>}, {pipeline_mode = #tpu.pipeline_mode<synchronous>, transform_indices = @transform_10, window_bounds = array<i64: 1, 128>}, {pipeline_mode = #tpu.pipeline_mode<synchronous>, transform_indices = @transform_11, window_bounds = array<i64: 128, 128>}, {pipeline_mode = #tpu.pipeline_mode<synchronous>, transform_indices = @transform_12, window_bounds = array<i64: 1, 128>}, {transform_indices = @transform_13, window_bounds = array<i64: 32, 128>}]} {
    %c0 = arith.constant 0 : index
    %c0_0 = arith.constant 0 : index
    %0 = vector.load %arg1[%c0, %c0_0] : memref<32x128xbf16, #tpu.memory_space<vmem>>, vector<32x128xbf16>
    %c0_1 = arith.constant 0 : index
    %c0_2 = arith.constant 0 : index
    %1 = vector.load %arg2[%c0_1, %c0_2] : memref<128x128xbf16, #tpu.memory_space<vmem>>, vector<128x128xbf16>
    %cst = arith.constant dense<0.000000e+00> : vector<32x128xf32>
    %2 = tpu.matmul %0, %1, %cst {dimension_numbers = #tpu.dot_dimension_numbers<[1], [0], [0], [1], [0, 0, 1, 1], [], []>} : vector<32x128xbf16>, vector<128x128xbf16>, vector<32x128xf32> -> vector<32x128xf32>
    %c0_3 = arith.constant 0 : index
    %c0_4 = arith.constant 0 : index
    %3 = vector.load %arg3[%c0_3, %c0_4] : memref<1x128xf32, #tpu.memory_space<vmem>>, vector<1x128xf32>
    %4 = vector.broadcast %3 : vector<1x128xf32> to vector<32x128xf32>
    %5 = arith.addf %2, %4 : vector<32x128xf32>
    %cst_5 = arith.constant 0.000000e+00 : f32
    %6 = vector.broadcast %cst_5 : f32 to vector<32x128xf32>
    %7 = arith.maximumf %5, %6 : vector<32x128xf32>
    %8 = arith.truncf %7 : vector<32x128xf32> to vector<32x128xbf16>
    %c0_6 = arith.constant 0 : index
    %c0_7 = arith.constant 0 : index
    %9 = vector.load %arg4[%c0_6, %c0_7] : memref<128x128xbf16, #tpu.memory_space<vmem>>, vector<128x128xbf16>
    %cst_8 = arith.constant dense<0.000000e+00> : vector<32x128xf32>
    %10 = tpu.matmul %8, %9, %cst_8 {dimension_numbers = #tpu.dot_dimension_numbers<[1], [0], [0], [1], [0, 0, 1, 1], [], []>} : vector<32x128xbf16>, vector<128x128xbf16>, vector<32x128xf32> -> vector<32x128xf32>
    %c0_9 = arith.constant 0 : index
    %c0_10 = arith.constant 0 : index
    %11 = vector.load %arg5[%c0_9, %c0_10] : memref<1x128xf32, #tpu.memory_space<vmem>>, vector<1x128xf32>
    %12 = vector.broadcast %11 : vector<1x128xf32> to vector<32x128xf32>
    %13 = arith.addf %10, %12 : vector<32x128xf32>
    %cst_11 = arith.constant 0.000000e+00 : f32
    %14 = vector.broadcast %cst_11 : f32 to vector<32x128xf32>
    %15 = arith.maximumf %13, %14 : vector<32x128xf32>
    %16 = arith.truncf %15 : vector<32x128xf32> to vector<32x128xbf16>
    %c0_12 = arith.constant 0 : index
    %c0_13 = arith.constant 0 : index
    %17 = vector.load %arg6[%c0_12, %c0_13] : memref<128x128xbf16, #tpu.memory_space<vmem>>, vector<128x128xbf16>
    %cst_14 = arith.constant dense<0.000000e+00> : vector<32x128xf32>
    %18 = tpu.matmul %16, %17, %cst_14 {dimension_numbers = #tpu.dot_dimension_numbers<[1], [0], [0], [1], [0, 0, 1, 1], [], []>} : vector<32x128xbf16>, vector<128x128xbf16>, vector<32x128xf32> -> vector<32x128xf32>
    %c0_15 = arith.constant 0 : index
    %c0_16 = arith.constant 0 : index
    %19 = vector.load %arg7[%c0_15, %c0_16] : memref<1x128xf32, #tpu.memory_space<vmem>>, vector<1x128xf32>
    %20 = vector.broadcast %19 : vector<1x128xf32> to vector<32x128xf32>
    %21 = arith.addf %18, %20 : vector<32x128xf32>
    %cst_17 = arith.constant 0.000000e+00 : f32
    %22 = vector.broadcast %cst_17 : f32 to vector<32x128xf32>
    %23 = arith.maximumf %21, %22 : vector<32x128xf32>
    %24 = arith.truncf %23 : vector<32x128xf32> to vector<32x128xbf16>
    %c0_18 = arith.constant 0 : index
    %c0_19 = arith.constant 0 : index
    %25 = vector.load %arg8[%c0_18, %c0_19] : memref<128x128xbf16, #tpu.memory_space<vmem>>, vector<128x128xbf16>
    %cst_20 = arith.constant dense<0.000000e+00> : vector<32x128xf32>
    %26 = tpu.matmul %24, %25, %cst_20 {dimension_numbers = #tpu.dot_dimension_numbers<[1], [0], [0], [1], [0, 0, 1, 1], [], []>} : vector<32x128xbf16>, vector<128x128xbf16>, vector<32x128xf32> -> vector<32x128xf32>
    %c0_21 = arith.constant 0 : index
    %c0_22 = arith.constant 0 : index
    %27 = vector.load %arg9[%c0_21, %c0_22] : memref<1x128xf32, #tpu.memory_space<vmem>>, vector<1x128xf32>
    %28 = vector.broadcast %27 : vector<1x128xf32> to vector<32x128xf32>
    %29 = arith.addf %26, %28 : vector<32x128xf32>
    %cst_23 = arith.constant 0.000000e+00 : f32
    %30 = vector.broadcast %cst_23 : f32 to vector<32x128xf32>
    %31 = arith.maximumf %29, %30 : vector<32x128xf32>
    %32 = arith.truncf %31 : vector<32x128xf32> to vector<32x128xbf16>
    %c0_24 = arith.constant 0 : index
    %c0_25 = arith.constant 0 : index
    %33 = vector.load %arg10[%c0_24, %c0_25] : memref<128x128xbf16, #tpu.memory_space<vmem>>, vector<128x128xbf16>
    %cst_26 = arith.constant dense<0.000000e+00> : vector<32x128xf32>
    %34 = tpu.matmul %32, %33, %cst_26 {dimension_numbers = #tpu.dot_dimension_numbers<[1], [0], [0], [1], [0, 0, 1, 1], [], []>} : vector<32x128xbf16>, vector<128x128xbf16>, vector<32x128xf32> -> vector<32x128xf32>
    %c0_27 = arith.constant 0 : index
    %c0_28 = arith.constant 0 : index
    %35 = vector.load %arg11[%c0_27, %c0_28] : memref<1x128xf32, #tpu.memory_space<vmem>>, vector<1x128xf32>
    %36 = vector.broadcast %35 : vector<1x128xf32> to vector<32x128xf32>
    %37 = arith.addf %34, %36 : vector<32x128xf32>
    %cst_29 = arith.constant 0.000000e+00 : f32
    %38 = vector.broadcast %cst_29 : f32 to vector<32x128xf32>
    %39 = arith.maximumf %37, %38 : vector<32x128xf32>
    %40 = arith.truncf %39 : vector<32x128xf32> to vector<32x128xbf16>
    %c0_30 = arith.constant 0 : index
    %c0_31 = arith.constant 0 : index
    %41 = vector.load %arg12[%c0_30, %c0_31] : memref<128x128xbf16, #tpu.memory_space<vmem>>, vector<128x128xbf16>
    %cst_32 = arith.constant dense<0.000000e+00> : vector<32x128xf32>
    %42 = tpu.matmul %40, %41, %cst_32 {dimension_numbers = #tpu.dot_dimension_numbers<[1], [0], [0], [1], [0, 0, 1, 1], [], []>} : vector<32x128xbf16>, vector<128x128xbf16>, vector<32x128xf32> -> vector<32x128xf32>
    %c0_33 = arith.constant 0 : index
    %c0_34 = arith.constant 0 : index
    %43 = vector.load %arg13[%c0_33, %c0_34] : memref<1x128xf32, #tpu.memory_space<vmem>>, vector<1x128xf32>
    %44 = vector.broadcast %43 : vector<1x128xf32> to vector<32x128xf32>
    %45 = arith.addf %42, %44 : vector<32x128xf32>
    %c0_35 = arith.constant 0 : index
    %c0_36 = arith.constant 0 : index
    %46 = vector.load %arg14[%c0_35, %c0_36] : memref<32x128xf32, #tpu.memory_space<vmem>>, vector<32x128xf32>
    tpu.vector_store %arg14[%c0_35, %c0_36], %45 {strides = array<i32>} : memref<32x128xf32, #tpu.memory_space<vmem>>, vector<32x128xf32>,
    return
  }
  func.func @transform_0(%arg0: i32) -> (i32, i32) {
    %c0_i32 = arith.constant 0 : i32
    %c0_i32_0 = arith.constant 0 : i32
    return %arg0, %c0_i32 : i32, i32
  }
  func.func @transform_1(%arg0: i32) -> (i32, i32) {
    %c0_i32 = arith.constant 0 : i32
    %c0_i32_0 = arith.constant 0 : i32
    %c0_i32_1 = arith.constant 0 : i32
    return %c0_i32, %c0_i32_0 : i32, i32
  }
  func.func @transform_2(%arg0: i32) -> (i32, i32) {
    %c0_i32 = arith.constant 0 : i32
    %c0_i32_0 = arith.constant 0 : i32
    %c0_i32_1 = arith.constant 0 : i32
    return %c0_i32, %c0_i32_0 : i32, i32
  }
  func.func @transform_3(%arg0: i32) -> (i32, i32) {
    %c0_i32 = arith.constant 0 : i32
    %c0_i32_0 = arith.constant 0 : i32
    %c0_i32_1 = arith.constant 0 : i32
    return %c0_i32, %c0_i32_0 : i32, i32
  }
  func.func @transform_4(%arg0: i32) -> (i32, i32) {
    %c0_i32 = arith.constant 0 : i32
    %c0_i32_0 = arith.constant 0 : i32
    %c0_i32_1 = arith.constant 0 : i32
    return %c0_i32, %c0_i32_0 : i32, i32
  }
  func.func @transform_5(%arg0: i32) -> (i32, i32) {
    %c0_i32 = arith.constant 0 : i32
    %c0_i32_0 = arith.constant 0 : i32
    %c0_i32_1 = arith.constant 0 : i32
    return %c0_i32, %c0_i32_0 : i32, i32
  }
  func.func @transform_6(%arg0: i32) -> (i32, i32) {
    %c0_i32 = arith.constant 0 : i32
    %c0_i32_0 = arith.constant 0 : i32
    %c0_i32_1 = arith.constant 0 : i32
    return %c0_i32, %c0_i32_0 : i32, i32
  }
  func.func @transform_7(%arg0: i32) -> (i32, i32) {
    %c0_i32 = arith.constant 0 : i32
    %c0_i32_0 = arith.constant 0 : i32
    %c0_i32_1 = arith.constant 0 : i32
    return %c0_i32, %c0_i32_0 : i32, i32
  }
  func.func @transform_8(%arg0: i32) -> (i32, i32) {
    %c0_i32 = arith.constant 0 : i32
    %c0_i32_0 = arith.constant 0 : i32
    %c0_i32_1 = arith.constant 0 : i32
    return %c0_i32, %c0_i32_0 : i32, i32
  }
  func.func @transform_9(%arg0: i32) -> (i32, i32) {
    %c0_i32 = arith.constant 0 : i32
    %c0_i32_0 = arith.constant 0 : i32
    %c0_i32_1 = arith.constant 0 : i32
    return %c0_i32, %c0_i32_0 : i32, i32
  }
  func.func @transform_10(%arg0: i32) -> (i32, i32) {
    %c0_i32 = arith.constant 0 : i32
    %c0_i32_0 = arith.constant 0 : i32
    %c0_i32_1 = arith.constant 0 : i32
    return %c0_i32, %c0_i32_0 : i32, i32
  }
  func.func @transform_11(%arg0: i32) -> (i32, i32) {
    %c0_i32 = arith.constant 0 : i32
    %c0_i32_0 = arith.constant 0 : i32
    %c0_i32_1 = arith.constant 0 : i32
    return %c0_i32, %c0_i32_0 : i32, i32
  }
  func.func @transform_12(%arg0: i32) -> (i32, i32) {
    %c0_i32 = arith.constant 0 : i32
    %c0_i32_0 = arith.constant 0 : i32
    %c0_i32_1 = arith.constant 0 : i32
    return %c0_i32, %c0_i32_0 : i32, i32
  }
  func.func @transform_13(%arg0: i32) -> (i32, i32) {
    %c0_i32 = arith.constant 0 : i32
    %c0_i32_0 = arith.constant 0 : i32
    return %arg0, %c0_i32 : i32, i32
  }
}

</mosaic_0001>

<bundles_post_ra>
// kernel: tpu_custom_call.1
= control target key start
LH: loop header
LB: loop body
LE: loop exit
PB: predicated region body
PF: predicated region fallthrough
CT: control target
= control target key end

     0   :  { %18 = vsyncpa [#allocation3], 0  ;;  %s1653_s0 = inlined_call_operand.hbm [shape: bf16[32,128], index: 0, kind: input, shape index: {}]   ;;  %s1654_s1 = inlined_call_operand.hbm [shape: bf16[128,128], index: 1, kind: input, shape index: {}]   ;;  %s1655_s2 = inlined_call_operand.vmem [shape: f32[1,128], index: 2, kind: input, shape index: {}]   ;;  %s1656_s3 = inlined_call_operand.hbm [shape: bf16[128,128], index: 3, kind: input, shape index: {}]   ;;  %s1657_s4 = inlined_call_operand.vmem [shape: f32[1,128], index: 4, kind: input, shape index: {}]   ;;  %s1658_s5 = inlined_call_operand.hbm [shape: bf16[128,128], index: 5, kind: input, shape index: {}]   ;;  %s1659_s6 = inlined_call_operand.vmem [shape: f32[1,128], index: 6, kind: input, shape index: {}]   ;;  %s1660_s7 = inlined_call_operand.hbm [shape: bf16[128,128], index: 7, kind: input, shape index: {}]   ;;  %s1661_s8 = inlined_call_operand.vmem [shape: f32[1,128], index: 8, kind: input, shape index: {}]   ;;  %s1662_s9 = inlined_call_operand.hbm [shape: bf16[128,128], index: 9, kind: input, shape index: {}]   ;;  %s1663_s10 = inlined_call_operand.vmem [shape: f32[1,128], index: 10, kind: input, shape index: {}]   ;;  %s1664_s11 = inlined_call_operand.hbm [shape: bf16[128,128], index: 11, kind: input, shape index: {}]   ;;  %s1665_s12 = inlined_call_operand.vmem [shape: f32[1,128], index: 12, kind: input, shape index: {}]   ;;  %s1666_s13 = inlined_call_operand.hbm [shape: f32[32,128], index: 13, kind: output, shape index: {}]  }
   0x1   :  { %19 = vsyncpa [#allocation6], 0 }
   0x2   :  { %20 = vsyncpa [#allocation9], 0 }
   0x3   :  { %21 = vsyncpa [#allocation12], 0 }
   0x4   :  { %22 = vsyncpa [#allocation4], 0  ;;  %s1415_s25 = smov [#allocation5]   ;;  %s1416_s27 = smov [#allocation8]  }
   0x5   :  { %s40_s26 = sshll.u32 %s1415_s25, 4  ;;  %s68_s28 = sshll.u32 %s1416_s27, 4  ;;  %s41_s26 = int_to_ptr.vmem [resolvable:$true] %s40_s26  ;;  %s1497_s28 = int_to_ptr.vmem [resolvable:$true] %s68_s28 }
   0x6   :  { %s1229_s14 = scalar_lea.hbm %s1654_s1, 1024 }
   0x7   :  { %p1230_p0 = scmp.ne.s32.totalorder %s1654_s1, %s1229_s14  ;;  %p1233_p1 = scmp.lt.u32.totalorder %s1229_s14, %s1654_s1 }
   0x9   :  { %p1235_p2 = pnand %p1233_p1, %p1230_p0 }
   0xb   :  { %1238 = shalt.err (!%p1235_p2)
}
   0xc   :  { %s1239_s19 = scalar_lea.vmem %s41_s26, 1024  ;;  %p1244_p4 = scmp.lt.s32.totalorder %s41_s26, %s41_s26 }
   0xd   :  { %p1240_p3 = scmp.ne.s32.totalorder %s41_s26, %s1239_s19  ;;  %p1245_p5 = scmp.lt.s32.totalorder %s1239_s19, %s1239_s19 }
   0xf   :  { %p1246_p6 = por %p1245_p5, %p1244_p4 }
  0x11   :  { %p1247_p7 = pnand %p1246_p6, %p1240_p3 }
  0x13   :  { %1250 = shalt.err (!%p1247_p7)
}
  0x14   :  { %s1417_s20 = smov 64   ;;  %s1418_s21 = smov 4  }
  0x15   :  { %46 = dma.hbm_to_vmem [thread:$0]  %s1654_s1, 1024, %s41_s26, [#allocation6], %s1417_s20, %s1417_s20, %s1418_s21  }
  0x16   :  { %s1251_s27 = scalar_lea.hbm %s1658_s5, 1024 }
  0x17   :  { %p1252_p8 = scmp.ne.s32.totalorder %s1658_s5, %s1251_s27  ;;  %p1255_p9 = scmp.lt.u32.totalorder %s1251_s27, %s1658_s5 }
  0x19   :  { %p1257_p10 = pnand %p1255_p9, %p1252_p8 }
  0x1b   :  { %1260 = shalt.err (!%p1257_p10)
}
  0x1c   :  { %s1261_s16 = scalar_lea.vmem %s1497_s28, 1024  ;;  %p1266_p12 = scmp.lt.s32.totalorder %s1497_s28, %s1497_s28 }
  0x1d   :  { %p1262_p11 = scmp.ne.s32.totalorder %s1497_s28, %s1261_s16  ;;  %p1267_p13 = scmp.lt.s32.totalorder %s1261_s16, %s1261_s16 }
  0x1f   :  { %p1268_p0 = por %p1267_p13, %p1266_p12 }
  0x21   :  { %p1269_p1 = pnand %p1268_p0, %p1262_p11 }
  0x23   :  { %1272 = shalt.err (!%p1269_p1)
}
  0x24   :  { %74 = dma.hbm_to_vmem [thread:$0]  %s1658_s5, 1024, %s1497_s28, [#allocation9], %s1417_s20, %s1417_s20, %s1418_s21  }
  0x25   :  { %s1419_s17 = smov [#allocation11]   ;;  %s1420_s19 = smov [#allocation2]  }
  0x26   :  { %s96_s18 = sshll.u32 %s1419_s17, 4  ;;  %s28_s22 = sshll.u32 %s1420_s19, 4  ;;  %s97_s18 = int_to_ptr.vmem [resolvable:$true] %s96_s18  ;;  %s1534_s22 = int_to_ptr.vmem [resolvable:$true] %s28_s22 }
  0x27   :  { %s1273_s25 = scalar_lea.hbm %s1662_s9, 1024 }
  0x28   :  { %p1274_p2 = scmp.ne.s32.totalorder %s1662_s9, %s1273_s25  ;;  %p1277_p3 = scmp.lt.u32.totalorder %s1273_s25, %s1662_s9 }
  0x2a   :  { %p1279_p4 = pnand %p1277_p3, %p1274_p2 }
  0x2c   :  { %1282 = shalt.err (!%p1279_p4)
}
  0x2d   :  { %s1283_s5 = scalar_lea.vmem %s97_s18, 1024  ;;  %p1288_p6 = scmp.lt.s32.totalorder %s97_s18, %s97_s18 }
  0x2e   :  { %p1284_p5 = scmp.ne.s32.totalorder %s97_s18, %s1283_s5  ;;  %p1289_p7 = scmp.lt.s32.totalorder %s1283_s5, %s1283_s5 }
  0x30   :  { %p1290_p8 = por %p1289_p7, %p1288_p6 }
  0x32   :  { %p1291_p9 = pnand %p1290_p8, %p1284_p5 }
  0x34   :  { %1294 = shalt.err (!%p1291_p9)
}
  0x35   :  { %102 = dma.hbm_to_vmem [thread:$0]  %s1662_s9, 1024, %s97_s18, [#allocation12], %s1417_s20, %s1417_s20, %s1418_s21  }
  0x36   :  { %s1295_s26 = scalar_lea.hbm %s1653_s0, 256 }
  0x37   :  { %p1296_p10 = scmp.ne.s32.totalorder %s1653_s0, %s1295_s26  ;;  %p1299_p11 = scmp.lt.u32.totalorder %s1295_s26, %s1653_s0 }
  0x39   :  { %p1301_p12 = pnand %p1299_p11, %p1296_p10 }
  0x3b   :  { %1304 = shalt.err (!%p1301_p12)
}
  0x3c   :  { %s1305_s25 = scalar_lea.vmem %s1534_s22, 256  ;;  %p1310_p0 = scmp.lt.s32.totalorder %s1534_s22, %s1534_s22 }
  0x3d   :  { %p1306_p13 = scmp.ne.s32.totalorder %s1534_s22, %s1305_s25  ;;  %p1311_p1 = scmp.lt.s32.totalorder %s1305_s25, %s1305_s25 }
  0x3f   :  { %p1312_p2 = por %p1311_p1, %p1310_p0 }
  0x41   :  { %p1313_p3 = pnand %p1312_p2, %p1306_p13 }
  0x43   :  { %1316 = shalt.err (!%p1313_p3)
}
  0x44   :  { %34 = dma.hbm_to_vmem [thread:$0]  %s1653_s0, 256, %s1534_s22, [#allocation3], %s1417_s20, %s1417_s20, %s1418_s21  }
  0x45   :  { %s1421_s27 = smov [#allocation7]   ;;  %s1422_s30 = smov [#allocation10]  }
  0x46   :  { %s54_s29 = sshll.u32 %s1421_s27, 4  ;;  %s82_s14 = sshll.u32 %s1422_s30, 4  ;;  %s55_s29 = int_to_ptr.vmem [resolvable:$true] %s54_s29  ;;  %s1571_s14 = int_to_ptr.vmem [resolvable:$true] %s82_s14 }
  0x47   :  { %s1317_s15 = scalar_lea.hbm %s1656_s3, 1024 }
  0x48   :  { %p1318_p4 = scmp.ne.s32.totalorder %s1656_s3, %s1317_s15  ;;  %p1321_p5 = scmp.lt.u32.totalorder %s1317_s15, %s1656_s3 }
  0x4a   :  { %p1323_p6 = pnand %p1321_p5, %p1318_p4 }
  0x4c   :  { %1326 = shalt.err (!%p1323_p6)
}
  0x4d   :  { %s1327_s0 = scalar_lea.vmem %s55_s29, 1024  ;;  %p1332_p8 = scmp.lt.s32.totalorder %s55_s29, %s55_s29 }
  0x4e   :  { %p1328_p7 = scmp.ne.s32.totalorder %s55_s29, %s1327_s0  ;;  %p1333_p9 = scmp.lt.s32.totalorder %s1327_s0, %s1327_s0 }
  0x50   :  { %p1334_p10 = por %p1333_p9, %p1332_p8 }
  0x52   :  { %p1335_p11 = pnand %p1334_p10, %p1328_p7 }
  0x54   :  { %1338 = shalt.err (!%p1335_p11)
}
  0x55   :  { %60 = dma.hbm_to_vmem [thread:$0]  %s1656_s3, 1024, %s55_s29, [#allocation6], %s1417_s20, %s1417_s20, %s1418_s21  }
  0x56   :  { %s1339_s25 = scalar_lea.hbm %s1660_s7, 1024 }
  0x57   :  { %p1340_p12 = scmp.ne.s32.totalorder %s1660_s7, %s1339_s25  ;;  %p1343_p13 = scmp.lt.u32.totalorder %s1339_s25, %s1660_s7 }
  0x59   :  { %p1345_p0 = pnand %p1343_p13, %p1340_p12 }
  0x5b   :  { %1348 = shalt.err (!%p1345_p0)
}
  0x5c   :  { %s1349_s5 = scalar_lea.vmem %s1571_s14, 1024  ;;  %p1354_p2 = scmp.lt.s32.totalorder %s1571_s14, %s1571_s14 }
  0x5d   :  { %p1350_p1 = scmp.ne.s32.totalorder %s1571_s14, %s1349_s5  ;;  %p1355_p3 = scmp.lt.s32.totalorder %s1349_s5, %s1349_s5 }
  0x5f   :  { %p1356_p4 = por %p1355_p3, %p1354_p2 }
  0x61   :  { %p1357_p5 = pnand %p1356_p4, %p1350_p1 }
  0x63   :  { %1360 = shalt.err (!%p1357_p5)
}
  0x64   :  { %88 = dma.hbm_to_vmem [thread:$0]  %s1660_s7, 1024, %s1571_s14, [#allocation9], %s1417_s20, %s1417_s20, %s1418_s21  }
  0x65   :  { %s1423_s28 = smov [#allocation13]   ;;  %s1361_s26 = scalar_lea.hbm %s1664_s11, 1024 }
  0x66   :  { %s110_s15 = sshll.u32 %s1423_s28, 4  ;;  %p1362_p6 = scmp.ne.s32.totalorder %s1664_s11, %s1361_s26  ;;  %s111_s15 = int_to_ptr.vmem [resolvable:$true] %s110_s15 }
  0x67   :  { %p1365_p7 = scmp.lt.u32.totalorder %s1361_s26, %s1664_s11 }
  0x69   :  { %p1367_p8 = pnand %p1365_p7, %p1362_p6 }
  0x6b   :  { %1370 = shalt.err (!%p1367_p8)
}
  0x6c   :  { %s1371_s23 = scalar_lea.vmem %s111_s15, 1024  ;;  %p1376_p10 = scmp.lt.s32.totalorder %s111_s15, %s111_s15 }
  0x6d   :  { %p1372_p9 = scmp.ne.s32.totalorder %s111_s15, %s1371_s23  ;;  %p1377_p11 = scmp.lt.s32.totalorder %s1371_s23, %s1371_s23 }
  0x6f   :  { %p1378_p12 = por %p1377_p11, %p1376_p10 }
  0x71   :  { %p1379_p13 = pnand %p1378_p12, %p1372_p9 }
  0x73   :  { %1382 = shalt.err (!%p1379_p13)
}
  0x74   :  { %116 = dma.hbm_to_vmem [thread:$0]  %s1664_s11, 1024, %s111_s15, [#allocation12], %s1417_s20, %s1417_s20, %s1418_s21  }
  0x75   :  { %1405 = dma.done.wait [#allocation3], 256  }
  0x76   :  { %1406 = vsyncadd [#allocation3], 4294967040 }
  0x77   :  { %1407 = dma.done.wait [#allocation6], 2048  }
  0x78   :  { %1408 = vsyncadd [#allocation6], 4294965248 }
  0x79   :  { %1409 = dma.done.wait [#allocation9], 2048  }
  0x7a   :  { %1410 = vsyncadd [#allocation9], 4294965248 }
  0x7b   :  { %1411 = dma.done.wait [#allocation12], 2048  }
  0x7c   :  { %1412 = vsyncadd [#allocation12], 4294965248  ;;  %v1179_v0 = vld [vmem:[#allocation5] sm:$0xff]   ;;  %v1180_v1 = vld [vmem:[#allocation5 + $0x8] sm:$0xff]  }
  0x7d   :  { %1047 = vmatprep.subr.bf16.mxu0 %v1179_v0  ;;  %v1181_v2 = vld [vmem:[#allocation5 + $0x10] sm:$0xff]   ;;  %v1182_v3 = vld [vmem:[#allocation5 + $0x18] sm:$0xff]   ;;  %v1189_v5 = vld [vmem:[#allocation7] sm:$0xff]  }
  0x7e   :  { %1048 = vmatpush3.bf16.msra.mxu0 %v1179_v0  ;;  %v1187_v4 = vld [vmem:[#allocation2] sm:$0xff]   ;;  %v1190_v6 = vld [vmem:[#allocation7 + $0x8] sm:$0xff]   ;;  %v1183_v7 = vld [vmem:[#allocation5 + $0x20] sm:$0xff]   ;;  %1067 = vmatprep.subr.bf16.mxu1 %v1189_v5 }
  0x7f   :  { %1049 = vmatprep.subr.bf16.mxu0 %v1180_v1  ;;  %1063 = vmatprep.mubr.bf16.mxu0 %v1187_v4  ;;  %v1191_v8 = vld [vmem:[#allocation7 + $0x10] sm:$0xff]   ;;  %v1184_v9 = vld [vmem:[#allocation5 + $0x28] sm:$0xff]   ;;  %v1192_v10 = vld [vmem:[#allocation7 + $0x18] sm:$0xff]  }
  0x80   :  { %1068 = vmatpush3.bf16.msra.mxu1 %v1189_v5  ;;  %v1185_v11 = vld [vmem:[#allocation5 + $0x30] sm:$0xff]   ;;  %v1193_v12 = vld [vmem:[#allocation7 + $0x20] sm:$0xff]   ;;  %v1186_v13 = vld [vmem:[#allocation5 + $0x38] sm:$0xff]  }
  0x81   :  { %1069 = vmatprep.subr.bf16.mxu1 %v1190_v6  ;;  %v1194_v14 = vld [vmem:[#allocation7 + $0x28] sm:$0xff]   ;;  %v1188_v15 = vld [vmem:[#allocation2 + $0x8] sm:$0xff]   ;;  %v1195_v16 = vld [vmem:[#allocation7 + $0x30] sm:$0xff]  }
  0x82   :  { %1050 = vmatpush3.bf16.msra.mxu0 %v1180_v1  ;;  %v1196_v17 = vld [vmem:[#allocation7 + $0x38] sm:$0xff]   ;;  %v1197_v18 = vld [vmem:[#allocation8] sm:$0xff]   ;;  %v1198_v19 = vld [vmem:[#allocation8 + $0x8] sm:$0xff]  }
  0x83   :  { %1051 = vmatprep.subr.bf16.mxu0 %v1181_v2  ;;  %v1199_v20 = vld [vmem:[#allocation8 + $0x10] sm:$0xff]   ;;  %v1200_v21 = vld [vmem:[#allocation8 + $0x18] sm:$0xff]   ;;  %v1201_v22 = vld [vmem:[#allocation8 + $0x20] sm:$0xff]  }
  0x84   :  { %1070 = vmatpush3.bf16.msra.mxu1 %v1190_v6  ;;  %v1202_v23 = vld [vmem:[#allocation8 + $0x28] sm:$0xff]   ;;  %v931_v24 = vld [vmem:[%s1655_s2] ss:$0 sm:$0xff]  ;;  %v1204_v40 = vld [vmem:[#allocation8 + $0x38] sm:$0xff]  }
  0x85   :  { %1071 = vmatprep.subr.bf16.mxu1 %v1191_v8  ;;  %v1203_v39 = vld [vmem:[#allocation8 + $0x30] sm:$0xff]   ;;  %v1205_v41 = vld [vmem:[#allocation10] sm:$0xff]   ;;  %v1206_v42 = vld [vmem:[#allocation10 + $0x8] sm:$0xff]  }
  0x86   :  { %1052 = vmatpush3.bf16.msra.mxu0 %v1181_v2  ;;  %v1207_v43 = vld [vmem:[#allocation10 + $0x10] sm:$0xff]   ;;  %v1208_v44 = vld [vmem:[#allocation10 + $0x18] sm:$0xff]   ;;  %v1209_v45 = vld [vmem:[#allocation10 + $0x20] sm:$0xff]  }
  0x87   :  { %1053 = vmatprep.subr.bf16.mxu0 %v1182_v3  ;;  %v1210_v46 = vld [vmem:[#allocation10 + $0x28] sm:$0xff]   ;;  %v942_v47 = vld [vmem:[%s1657_s4] ss:$0 sm:$0xff]  ;;  %v1212_v63 = vld [vmem:[#allocation10 + $0x38] sm:$0xff]  }
  0x88   :  { %1072 = vmatpush3.bf16.msra.mxu1 %v1191_v8  ;;  %v1211_v62 = vld [vmem:[#allocation10 + $0x30] sm:$0xff]   ;;  %v1213_v0 = vld [vmem:[#allocation11] sm:$0xff]   ;;  %v1214_v1 = vld [vmem:[#allocation11 + $0x8] sm:$0xff]  }
  0x89   :  { %1073 = vmatprep.subr.bf16.mxu1 %v1192_v10  ;;  %v1215_v2 = vld [vmem:[#allocation11 + $0x10] sm:$0xff]   ;;  %v1217_v4 = vld [vmem:[#allocation11 + $0x20] sm:$0xff]   ;;  %v1218_v5 = vld [vmem:[#allocation11 + $0x28] sm:$0xff]  }
  0x8a   :  { %1054 = vmatpush3.bf16.msra.mxu0 %v1182_v3  ;;  %v1216_v3 = vld [vmem:[#allocation11 + $0x18] sm:$0xff]   ;;  %v951_v6 = vld [vmem:[%s1659_s6] ss:$0 sm:$0xff] }
  0x8b   :  { %1055 = vmatprep.subr.bf16.mxu0 %v1183_v7 }
  0x8c   :  { %1074 = vmatpush3.bf16.msra.mxu1 %v1192_v10 }
  0x8d   :  { %1075 = vmatprep.subr.bf16.mxu1 %v1193_v12 }
  0x8e   :  { %1056 = vmatpush3.bf16.msra.mxu0 %v1183_v7 }
  0x8f   :  { %1057 = vmatprep.subr.bf16.mxu0 %v1184_v9 }
  0x90   :  { %1076 = vmatpush3.bf16.msra.mxu1 %v1193_v12 }
  0x91   :  { %1077 = vmatprep.subr.bf16.mxu1 %v1194_v14 }
  0x92   :  { %1058 = vmatpush3.bf16.msra.mxu0 %v1184_v9 }
  0x93   :  { %1059 = vmatprep.subr.bf16.mxu0 %v1185_v11 }
  0x94   :  { %1078 = vmatpush3.bf16.msra.mxu1 %v1194_v14 }
  0x95   :  { %1079 = vmatprep.subr.bf16.mxu1 %v1195_v16 }
  0x96   :  { %1060 = vmatpush3.bf16.msra.mxu0 %v1185_v11 }
  0x97   :  { %1061 = vmatprep.subr.bf16.mxu0 %v1186_v13 }
  0x98   :  { %1080 = vmatpush3.bf16.msra.mxu1 %v1195_v16 }
  0x99   :  { %1081 = vmatprep.subr.bf16.mxu1 %v1196_v17 }
  0x9a   :  { %1062 = vmatpush3.bf16.msra.mxu0 %v1186_v13 }
  0x9b   :  { %1087 = vmatprep.subr.bf16.mxu0 %v1197_v18 }
  0x9c   :  { %1082 = vmatpush3.bf16.msra.mxu1 %v1196_v17 }
  0x9d   :  { %1064 = vmatmul.mubr.bf16.vlgmr.msra.gmra.mrb[0].mxu0 %v1188_v15  ;;  %1107 = vmatprep.subr.bf16.mxu1 %v1205_v41 }
  0x9e   :  { %1088 = vmatpush3.bf16.msra.mxu0 %v1197_v18 }
  0x9f   :  { %1089 = vmatprep.subr.bf16.mxu0 %v1198_v19 }
  0xa2   :  { %1090 = vmatpush3.bf16.msra.mxu0 %v1198_v19 }
  0xa3   :  { %1091 = vmatprep.subr.bf16.mxu0 %v1199_v20 }
  0xa6   :  { %1092 = vmatpush3.bf16.msra.mxu0 %v1199_v20 }
  0xa7   :  { %1093 = vmatprep.subr.bf16.mxu0 %v1200_v21 }
  0xaa   :  { %1094 = vmatpush3.bf16.msra.mxu0 %v1200_v21  ;;  %v1219_v21 = vld [vmem:[#allocation11 + $0x30] sm:$0xff]  }
  0xab   :  { %1095 = vmatprep.subr.bf16.mxu0 %v1201_v22 }
  0xae   :  { %1096 = vmatpush3.bf16.msra.mxu0 %v1201_v22  ;;  %v1220_v22 = vld [vmem:[#allocation11 + $0x38] sm:$0xff]  }
  0xaf   :  { %1097 = vmatprep.subr.bf16.mxu0 %v1202_v23 }
  0xb2   :  { %1098 = vmatpush3.bf16.msra.mxu0 %v1202_v23  ;;  %v1221_v23 = vld [vmem:[#allocation13] sm:$0xff]  }
  0xb3   :  { %1099 = vmatprep.subr.bf16.mxu0 %v1203_v39 }
  0xb6   :  { %1100 = vmatpush3.bf16.msra.mxu0 %v1203_v39 }
  0xb7   :  { %1101 = vmatprep.subr.bf16.mxu0 %v1204_v40 }
  0xba   :  { %1102 = vmatpush3.bf16.msra.mxu0 %v1204_v40 }
  0xbb   :  { %1127 = vmatprep.subr.bf16.mxu0 %v1213_v0 }
 0x170   :  { %v1065_v25 = vpop.f32.mrb[0].mxu0 }
 0x171   :  { %v271_v26 = vadd.f32 %v1065_v25, %v931_v24  ;;  %v262_v27 = vpop.f32.mrb[1].mxu0  ;;  %v1223_v25 = vld [vmem:[#allocation13 + $0x10] sm:$0xff]  }
 0x172   :  { %v263_v28 = vadd.f32 %v931_v24, %v262_v27  ;;  %v1066_v29 = vpop.f32.mrb[2].mxu0  ;;  %v1225_v27 = vld [vmem:[#allocation13 + $0x20] sm:$0xff]  }
 0x173   :  { %v274_v30 = vadd.f32 %v1066_v29, %v931_v24  ;;  %v265_v31 = vpop.f32.mrb[3].mxu0  ;;  %v279_v33 = vmax.f32 %v271_v26, 0.0  ;;  %v1224_v26 = vld [vmem:[#allocation13 + $0x18] sm:$0xff]   ;;  %v960_v29 = vld [vmem:[%s1661_s8] ss:$0 sm:$0xff] }
 0x174   :  { %v266_v32 = vadd.f32 %v931_v24, %v265_v31  ;;  %v277_v35 = vmax.f32 %v263_v28, 0.0  ;;  %v1222_v24 = vld [vmem:[#allocation13 + $0x8] sm:$0xff]  }
 0x175   :  { %v280_v34 = vmax.f32 %v274_v30, 0.0  ;;  %v1226_v28 = vld [vmem:[#allocation13 + $0x28] sm:$0xff]  }
 0x176   :  { %v278_v36 = vmax.f32 %v266_v32, 0.0 }
 0x177   :  { %v282_v37 = vpack.c.bf16 %v280_v34, %v279_v33 }
 0x178   :  { %v281_v38 = vpack.c.bf16 %v278_v36, %v277_v35 }
 0x17a   :  { %1083 = vmatprep.mubr.bf16.mxu1 %v281_v38 }
 0x17b   :  { %1084 = vmatmul.mubr.bf16.vlgmr.msra.gmra.mrb[0].mxu1 %v282_v37 }
 0x17c   :  { %1108 = vmatpush3.bf16.msra.mxu1 %v1205_v41 }
 0x17d   :  { %1109 = vmatprep.subr.bf16.mxu1 %v1206_v42 }
 0x180   :  { %1110 = vmatpush3.bf16.msra.mxu1 %v1206_v42 }
 0x181   :  { %1111 = vmatprep.subr.bf16.mxu1 %v1207_v43 }
 0x184   :  { %1112 = vmatpush3.bf16.msra.mxu1 %v1207_v43 }
 0x185   :  { %1113 = vmatprep.subr.bf16.mxu1 %v1208_v44 }
 0x188   :  { %1114 = vmatpush3.bf16.msra.mxu1 %v1208_v44  ;;  %v1227_v44 = vld [vmem:[#allocation13 + $0x30] sm:$0xff]  }
 0x189   :  { %1115 = vmatprep.subr.bf16.mxu1 %v1209_v45 }
 0x18c   :  { %1116 = vmatpush3.bf16.msra.mxu1 %v1209_v45  ;;  %v1228_v45 = vld [vmem:[#allocation13 + $0x38] sm:$0xff]  }
 0x18d   :  { %1117 = vmatprep.subr.bf16.mxu1 %v1210_v46 }
 0x190   :  { %1118 = vmatpush3.bf16.msra.mxu1 %v1210_v46  ;;  %v969_v46 = vld [vmem:[%s1663_s10] ss:$0 sm:$0xff]  ;;  %s1424_s10 = smov [#allocation14]  }
 0x191   :  { %1119 = vmatprep.subr.bf16.mxu1 %v1211_v62  ;;  %s916_s30 = sshll.u32 %s1424_s10, 4  ;;  %s917_s30 = int_to_ptr.vmem [resolvable:$true] %s916_s30 }
 0x192   :  { %s1383_s5 = scalar_lea.vmem %s917_s30, 512  ;;  %p1388_p1 = scmp.lt.s32.totalorder %s917_s30, %s917_s30 }
 0x193   :  { %p1384_p0 = scmp.ne.s32.totalorder %s917_s30, %s1383_s5  ;;  %p1389_p2 = scmp.lt.s32.totalorder %s1383_s5, %s1383_s5 }
 0x194   :  { %1120 = vmatpush3.bf16.msra.mxu1 %v1211_v62 }
 0x195   :  { %1121 = vmatprep.subr.bf16.mxu1 %v1212_v63  ;;  %p1390_p3 = por %p1389_p2, %p1388_p1 }
 0x197   :  { %p1391_p4 = pnand %p1390_p3, %p1384_p0 }
 0x198   :  { %1122 = vmatpush3.bf16.msra.mxu1 %v1212_v63 }
 0x199   :  { %1147 = vmatprep.subr.bf16.mxu1 %v1221_v23 }
 0x24e   :  { %v1085_v48 = vpop.f32.mrb[0].mxu1 }
 0x24f   :  { %v397_v49 = vadd.f32 %v1085_v48, %v942_v47  ;;  %v388_v50 = vpop.f32.mrb[1].mxu1 }
 0x250   :  { %v389_v51 = vadd.f32 %v942_v47, %v388_v50  ;;  %v1086_v52 = vpop.f32.mrb[2].mxu1 }
 0x251   :  { %v400_v53 = vadd.f32 %v1086_v52, %v942_v47  ;;  %v391_v54 = vpop.f32.mrb[3].mxu1  ;;  %v405_v56 = vmax.f32 %v397_v49, 0.0 }
 0x252   :  { %v392_v55 = vadd.f32 %v942_v47, %v391_v54  ;;  %v403_v58 = vmax.f32 %v389_v51, 0.0 }
 0x253   :  { %v406_v57 = vmax.f32 %v400_v53, 0.0 }
 0x254   :  { %v404_v59 = vmax.f32 %v392_v55, 0.0 }
 0x255   :  { %v408_v60 = vpack.c.bf16 %v406_v57, %v405_v56 }
 0x256   :  { %v407_v61 = vpack.c.bf16 %v404_v59, %v403_v58 }
 0x258   :  { %1103 = vmatprep.mubr.bf16.mxu0 %v407_v61  ;;  %v978_v61 = vld [vmem:[%s1665_s12] ss:$0 sm:$0xff] }
 0x259   :  { %1104 = vmatmul.mubr.bf16.vlgmr.msra.gmra.mrb[4].mxu0 %v408_v60 }
 0x25a   :  { %1128 = vmatpush3.bf16.msra.mxu0 %v1213_v0 }
 0x25b   :  { %1129 = vmatprep.subr.bf16.mxu0 %v1214_v1 }
 0x25e   :  { %1130 = vmatpush3.bf16.msra.mxu0 %v1214_v1 }
 0x25f   :  { %1131 = vmatprep.subr.bf16.mxu0 %v1215_v2 }
 0x262   :  { %1132 = vmatpush3.bf16.msra.mxu0 %v1215_v2 }
 0x263   :  { %1133 = vmatprep.subr.bf16.mxu0 %v1216_v3 }
 0x266   :  { %1134 = vmatpush3.bf16.msra.mxu0 %v1216_v3 }
 0x267   :  { %1135 = vmatprep.subr.bf16.mxu0 %v1217_v4 }
 0x26a   :  { %1136 = vmatpush3.bf16.msra.mxu0 %v1217_v4 }
 0x26b   :  { %1137 = vmatprep.subr.bf16.mxu0 %v1218_v5 }
 0x26e   :  { %1138 = vmatpush3.bf16.msra.mxu0 %v1218_v5 }
 0x26f   :  { %1139 = vmatprep.subr.bf16.mxu0 %v1219_v21 }
 0x272   :  { %1140 = vmatpush3.bf16.msra.mxu0 %v1219_v21 }
 0x273   :  { %1141 = vmatprep.subr.bf16.mxu0 %v1220_v22 }
 0x276   :  { %1142 = vmatpush3.bf16.msra.mxu0 %v1220_v22 }
 0x32c   :  { %v1105_v7 = vpop.f32.mrb[4].mxu0 }
 0x32d   :  { %v523_v8 = vadd.f32 %v1105_v7, %v951_v6  ;;  %v514_v9 = vpop.f32.mrb[5].mxu0 }
 0x32e   :  { %v515_v10 = vadd.f32 %v951_v6, %v514_v9  ;;  %v1106_v11 = vpop.f32.mrb[6].mxu0 }
 0x32f   :  { %v526_v12 = vadd.f32 %v1106_v11, %v951_v6  ;;  %v517_v13 = vpop.f32.mrb[7].mxu0  ;;  %v531_v15 = vmax.f32 %v523_v8, 0.0 }
 0x330   :  { %v518_v14 = vadd.f32 %v951_v6, %v517_v13  ;;  %v529_v17 = vmax.f32 %v515_v10, 0.0 }
 0x331   :  { %v532_v16 = vmax.f32 %v526_v12, 0.0 }
 0x332   :  { %v530_v18 = vmax.f32 %v518_v14, 0.0 }
 0x333   :  { %v534_v19 = vpack.c.bf16 %v532_v16, %v531_v15 }
 0x334   :  { %v533_v20 = vpack.c.bf16 %v530_v18, %v529_v17 }
 0x336   :  { %1123 = vmatprep.mubr.bf16.mxu1 %v533_v20 }
 0x337   :  { %1124 = vmatmul.mubr.bf16.vlgmr.msra.gmra.mrb[4].mxu1 %v534_v19 }
 0x338   :  { %1148 = vmatpush3.bf16.msra.mxu1 %v1221_v23 }
 0x339   :  { %1149 = vmatprep.subr.bf16.mxu1 %v1222_v24 }
 0x33c   :  { %1150 = vmatpush3.bf16.msra.mxu1 %v1222_v24 }
 0x33d   :  { %1151 = vmatprep.subr.bf16.mxu1 %v1223_v25 }
 0x340   :  { %1152 = vmatpush3.bf16.msra.mxu1 %v1223_v25 }
 0x341   :  { %1153 = vmatprep.subr.bf16.mxu1 %v1224_v26 }
 0x344   :  { %1154 = vmatpush3.bf16.msra.mxu1 %v1224_v26 }
 0x345   :  { %1155 = vmatprep.subr.bf16.mxu1 %v1225_v27 }
 0x348   :  { %1156 = vmatpush3.bf16.msra.mxu1 %v1225_v27 }
 0x349   :  { %1157 = vmatprep.subr.bf16.mxu1 %v1226_v28 }
 0x34c   :  { %1158 = vmatpush3.bf16.msra.mxu1 %v1226_v28 }
 0x34d   :  { %1159 = vmatprep.subr.bf16.mxu1 %v1227_v44 }
 0x350   :  { %1160 = vmatpush3.bf16.msra.mxu1 %v1227_v44 }
 0x351   :  { %1161 = vmatprep.subr.bf16.mxu1 %v1228_v45 }
 0x354   :  { %1162 = vmatpush3.bf16.msra.mxu1 %v1228_v45 }
 0x40a   :  { %v1125_v30 = vpop.f32.mrb[4].mxu1 }
 0x40b   :  { %v649_v31 = vadd.f32 %v1125_v30, %v960_v29  ;;  %v640_v32 = vpop.f32.mrb[5].mxu1 }
 0x40c   :  { %v641_v33 = vadd.f32 %v960_v29, %v640_v32  ;;  %v1126_v34 = vpop.f32.mrb[6].mxu1 }
 0x40d   :  { %v652_v35 = vadd.f32 %v1126_v34, %v960_v29  ;;  %v643_v36 = vpop.f32.mrb[7].mxu1  ;;  %v657_v38 = vmax.f32 %v649_v31, 0.0 }
 0x40e   :  { %v644_v37 = vadd.f32 %v960_v29, %v643_v36  ;;  %v655_v40 = vmax.f32 %v641_v33, 0.0 }
 0x40f   :  { %v658_v39 = vmax.f32 %v652_v35, 0.0 }
 0x410   :  { %v656_v41 = vmax.f32 %v644_v37, 0.0 }
 0x411   :  { %v660_v42 = vpack.c.bf16 %v658_v39, %v657_v38 }
 0x412   :  { %v659_v43 = vpack.c.bf16 %v656_v41, %v655_v40 }
 0x414   :  { %1143 = vmatprep.mubr.bf16.mxu0 %v659_v43 }
 0x415   :  { %1144 = vmatmul.mubr.bf16.vlgmr.msra.gmra.mrb[8].mxu0 %v660_v42 }
 0x4e8   :  { %v1145_v47 = vpop.f32.mrb[8].mxu0 }
 0x4e9   :  { %v775_v48 = vadd.f32 %v1145_v47, %v969_v46  ;;  %v766_v49 = vpop.f32.mrb[9].mxu0 }
 0x4ea   :  { %v767_v50 = vadd.f32 %v969_v46, %v766_v49  ;;  %v1146_v51 = vpop.f32.mrb[10].mxu0 }
 0x4eb   :  { %v778_v52 = vadd.f32 %v1146_v51, %v969_v46  ;;  %v769_v53 = vpop.f32.mrb[11].mxu0  ;;  %v783_v55 = vmax.f32 %v775_v48, 0.0 }
 0x4ec   :  { %v770_v54 = vadd.f32 %v969_v46, %v769_v53  ;;  %v781_v57 = vmax.f32 %v767_v50, 0.0 }
 0x4ed   :  { %v784_v56 = vmax.f32 %v778_v52, 0.0 }
 0x4ee   :  { %v782_v58 = vmax.f32 %v770_v54, 0.0 }
 0x4ef   :  { %v786_v59 = vpack.c.bf16 %v784_v56, %v783_v55 }
 0x4f0   :  { %v785_v60 = vpack.c.bf16 %v782_v58, %v781_v57 }
 0x4f2   :  { %1163 = vmatprep.mubr.bf16.mxu1 %v785_v60 }
 0x4f3   :  { %1164 = vmatmul.mubr.bf16.vlgmr.msra.gmra.mrb[8].mxu1 %v786_v59 }
 0x5c6   :  { %v1165_v62 = vpop.f32.mrb[8].mxu1 }
 0x5c7   :  { %v901_v63 = vadd.f32 %v1165_v62, %v978_v61  ;;  %v892_v0 = vpop.f32.mrb[9].mxu1 }
 0x5c8   :  { %v893_v1 = vadd.f32 %v978_v61, %v892_v0  ;;  %v1166_v2 = vpop.f32.mrb[10].mxu1 }
 0x5c9   :  { %909 = vst [vmem:[#allocation14 + $0x10] sm:$0xff] %v901_v63  ;;  %v904_v3 = vadd.f32 %v1166_v2, %v978_v61  ;;  %v895_v4 = vpop.f32.mrb[11].mxu1 }
 0x5ca   :  { %907 = vst [vmem:[#allocation14] sm:$0xff] %v893_v1  ;;  %v896_v5 = vadd.f32 %v978_v61, %v895_v4 }
 0x5cb   :  { %910 = vst [vmem:[#allocation14 + $0x18] sm:$0xff] %v904_v3 }
 0x5cc   :  { %908 = vst [vmem:[#allocation14 + $0x8] sm:$0xff] %v896_v5 }
 0x5cd   :  { %1394 = shalt.err (!%p1391_p4)
}
 0x5ce   :  { %s1395_s29 = scalar_lea.hbm %s1666_s13, 512 }
 0x5cf   :  { %p1396_p5 = scmp.ne.s32.totalorder %s1666_s13, %s1395_s29  ;;  %p1399_p6 = scmp.lt.u32.totalorder %s1395_s29, %s1666_s13 }
 0x5d1   :  { %p1401_p7 = pnand %p1399_p6, %p1396_p5 }
 0x5d3   :  { %1404 = shalt.err (!%p1401_p7)
}
 0x5d4   :  { %s1425_s26 = smov 128   ;;  %s1426_s17 = smov 8  }
 0x5d5   :  { %922 = dma.vmem_to_hbm [thread:$0]  %s917_s30, 512, %s1666_s13, [#allocation4], %s1425_s26, %s1425_s26, %s1426_s17  }
 0x5d6   :  { %1413 = dma.done.wait [#allocation4], 512  }
 0x5d7   :  { %1414 = vsyncadd [#allocation4], 4294966784 }
 0x5d8   :  { %926 = vsyncpa [#allocation3], 1 }
 0x5d9   :  { %927 = vsyncpa [#allocation6], 1 }
 0x5da   :  { %928 = vsyncpa [#allocation9], 1 }
 0x5db   :  { %929 = vsyncpa [#allocation12], 1 }
 0x5dc   :  { %930 = vsyncpa [#allocation4], 1 }

</bundles_post_ra>
